<compile_context>
chip_gen: v7x
topology: tpu7x:2x2x1
jax: 0.10.0
libtpu: 0.0.40
codegen_flags: <defaults>
</compile_context>

<pallas_src>
import functools

import jax
import jax.numpy as jnp
from jax.experimental import pallas as pl
from jax.experimental.pallas import tpu as pltpu


def _rmsnorm_kernel(x_ref, w_ref, o_ref, *, eps):
    # x_ref: (TR, H) block of hidden_states; w_ref: (1, H) weight row.
    x32 = x_ref[...].astype(jnp.float32)
    var = jnp.mean(x32 * x32, axis=-1, keepdims=True)
    norm = x32 * jax.lax.rsqrt(var + eps)          # rsqrt -> EUP slot (free here)
    # Match torch: cast normalized activations back to the input dtype first,
    # then scale by (1 + weight) with f32 promotion.
    scaled = (1.0 + w_ref[...].astype(jnp.float32)) * norm.astype(x_ref.dtype)
    o_ref[...] = scaled.astype(o_ref.dtype)


def _round_up(x, m):
    return ((x + m - 1) // m) * m


def _vmem_capacity_bytes():
    # Per-core VMEM: 128 MiB on v5e/v6e, 64 MiB on v7x.
    try:
        return int(pltpu.get_tpu_info().vmem_capacity_bytes)
    except Exception:
        return 64 << 20   # conservative fallback (v7x per-TC)


def _select_row_tile(S, H, in_itemsize, out_itemsize, vmem_budget):
    # Packed-sublane multiple: 8 rows for 32-bit, 16 for bf16/f16, 32 for int8/fp8.
    mult = max(8, 32 // max(in_itemsize, 1))
    # Per-row VMEM cost for the in-flight block: double-buffered input + output
    # blocks plus ~2 f32 temporaries (x32, norm) that Mosaic materializes.
    per_row = H * (2 * in_itemsize + 2 * out_itemsize + 2 * 4)
    rt = vmem_budget // max(per_row, 1)
    # Cap the *input* block at ~8 MiB: per-step overhead (~0.35 us) is already
    # fully hidden there and larger blocks just consume VMEM.
    rt = min(rt, max((8 << 20) // max(H * in_itemsize, 1), mult))
    # Guarantee >= 2 grid steps whenever S allows it so the "parallel" row axis
    # actually splits across both TensorCores on v7x (no-op on v5e/v6e).
    if S >= 2 * mult:
        rt = min(rt, _round_up(-(-S // 2), mult))
    rt = (max(rt, mult) // mult) * mult            # round down to packing multiple
    rt = min(rt, _round_up(S, mult))               # don't exceed (padded) seq length
    return max(rt, mult)


def unpadded_gemma_rms_norm(hidden_states, weight, eps, *, row_tile=None,
                            out_dtype=None):
    """hidden_states: (..., H); weight: (H,); eps: python float."""
    orig_shape = hidden_states.shape
    H = orig_shape[-1]
    x2d = hidden_states.reshape(-1, H)
    S = x2d.shape[0]
    in_itemsize = jnp.dtype(x2d.dtype).itemsize

    # Default follows torch promotion of (1 + weight[f32]) * x[input_dtype].
    # Pass out_dtype=hidden_states.dtype to halve writeback bytes for bf16
    # activations (biggest lever for this mem-bound kernel) when acceptable.
    if out_dtype is None:
        out_dtype = jnp.promote_types(weight.dtype, hidden_states.dtype)
    out_itemsize = jnp.dtype(out_dtype).itemsize

    vmem_cap = _vmem_capacity_bytes()
    # Use roughly half the per-core capacity for the pipelined block footprint:
    # v5e/v6e (128 MiB) -> ~60 MiB budget, v7x (64 MiB) -> ~28 MiB budget.
    vmem_budget = max(vmem_cap // 2 - (4 << 20), 8 << 20)

    if row_tile is None:
        row_tile = _select_row_tile(S, H, in_itemsize, out_itemsize, vmem_budget)

    grid = pl.cdiv(S, row_tile)                    # ragged tail handled by Pallas

    # Footprint: double-buffered in/out blocks + f32 temporaries + weight + slack.
    vmem_needed = (row_tile * H * (2 * in_itemsize + 2 * out_itemsize + 2 * 4)
                   + H * 4 + (2 << 20))
    # Raise above the scoped defaults (16 MiB v5e / 32 MiB v6e,v7x) but stay
    # under physical capacity with headroom.
    vmem_limit = int(min(max(vmem_needed, 32 << 20), vmem_cap - (8 << 20)))

    w2d = weight.reshape(1, H)
    kernel = functools.partial(_rmsnorm_kernel, eps=float(eps))

    out2d = pl.pallas_call(
        kernel,
        out_shape=jax.ShapeDtypeStruct((S, H), out_dtype),
        grid_spec=pltpu.PrefetchScalarGridSpec(
            num_scalar_prefetch=0,
            grid=(grid,),
            in_specs=[
                pl.BlockSpec((row_tile, H), lambda i: (i, 0)),
                pl.BlockSpec((1, H), lambda i: (0, 0)),   # weight block reused
            ],
            out_specs=pl.BlockSpec((row_tile, H), lambda i: (i, 0)),
        ),
        compiler_params=pltpu.CompilerParams(
            dimension_semantics=("parallel",),            # row axis -> both TCs on v7x
            vmem_limit_bytes=vmem_limit,
        ),
    )(x2d, w2d)
    return out2d.reshape(orig_shape)


def _reference(hidden_states, weight, eps):
    x32 = hidden_states.astype(jnp.float32)
    var = jnp.mean(x32 * x32, axis=-1, keepdims=True)
    norm = x32 * jax.lax.rsqrt(var + eps)
    return (1.0 + weight.astype(jnp.float32)) * norm.astype(hidden_states.dtype)


if __name__ == "__main__":
    key = jax.random.PRNGKey(0)
    k_x, k_w, k_x2 = jax.random.split(key, 3)
    eps = 1e-6

    # Case 1: f32 activations, seq length NOT a multiple of the tile
    # (exercises the cdiv ragged-tail path and the >=2-step grid split).
    S1, H1 = 140, 256
    x1 = jax.random.normal(k_x, (S1, H1), dtype=jnp.float32)
    w1 = 0.01 * jax.random.normal(k_w, (H1,), dtype=jnp.float32)
    out1 = jax.block_until_ready(unpadded_gemma_rms_norm(x1, w1, eps))
    ref1 = _reference(x1, w1, eps)
    assert out1.shape == ref1.shape and out1.dtype == ref1.dtype
    assert jnp.max(jnp.abs(out1 - ref1)) < 1e-5

    # Case 2: bf16 activations (exercises the packed-sublane tile multiple and
    # the cast-before-(1+w) double-rounding path; default out dtype = f32
    # matches torch promotion with an f32 weight).
    S2, H2 = 48, 128
    x2 = jax.random.normal(k_x2, (S2, H2), dtype=jnp.float32).astype(jnp.bfloat16)
    w2 = 0.01 * jax.random.normal(k_w, (H2,), dtype=jnp.float32)
    out2 = jax.block_until_ready(unpadded_gemma_rms_norm(x2, w2, eps))
    ref2 = _reference(x2, w2, eps)
    assert out2.shape == ref2.shape and out2.dtype == ref2.dtype
    assert jnp.max(jnp.abs(out2 - ref2)) < 2e-2

    # Case 3: bf16 activations with bf16 output override (the bandwidth-saving
    # mode) — numerics only differ by the final down-cast.
    out3 = jax.block_until_ready(
        unpadded_gemma_rms_norm(x2, w2, eps, out_dtype=jnp.bfloat16))
    assert out3.dtype == jnp.bfloat16
    assert jnp.max(jnp.abs(out3.astype(jnp.float32) - ref2)) < 3e-2

    print("KERNEL_OK")
</pallas_src>

<mosaic_0001>
module attributes {stable_mosaic.version = 11 : i64} {
  func.func @_rmsnorm_kernel(%arg0: i32, %arg1: memref<72x256xf32, #tpu.memory_space<vmem>>, %arg2: memref<1x256xf32, #tpu.memory_space<vmem>>, %arg3: memref<72x256xf32, #tpu.memory_space<vmem>>) attributes {dimension_semantics = [#tpu.dimension_semantics<parallel>], iteration_bounds = array<i64: 2>, scalar_prefetch = 0 : i64, scratch_operands = 0 : i64, tpu.core_type = #tpu.core_type<tc>, window_params = [{transform_indices = @transform_0, window_bounds = array<i64: 72, 256>}, {pipeline_mode = #tpu.pipeline_mode<synchronous>, transform_indices = @transform_1, window_bounds = array<i64: 1, 256>}, {transform_indices = @transform_2, window_bounds = array<i64: 72, 256>}]} {
    %c0 = arith.constant 0 : index
    %c0_0 = arith.constant 0 : index
    %0 = vector.load %arg1[%c0, %c0_0] : memref<72x256xf32, #tpu.memory_space<vmem>>, vector<72x256xf32>
    %1 = arith.mulf %0, %0 : vector<72x256xf32>
    %cst = arith.constant dense<0.000000e+00> : vector<72xf32>
    %2 = vector.multi_reduction <add>, %1, %cst [1] : vector<72x256xf32> to vector<72xf32>
    %3 = vector.shape_cast %2 : vector<72xf32> to vector<72x1xf32>
    %cst_1 = arith.constant 2.560000e+02 : f32
    %4 = vector.broadcast %cst_1 : f32 to vector<72x1xf32>
    %5 = arith.divf %3, %4 : vector<72x1xf32>
    %cst_2 = arith.constant 9.99999997E-7 : f32
    %6 = vector.broadcast %cst_2 : f32 to vector<72x1xf32>
    %7 = arith.addf %5, %6 : vector<72x1xf32>
    %8 = math.rsqrt %7 : vector<72x1xf32>
    %9 = vector.broadcast %8 : vector<72x1xf32> to vector<72x256xf32>
    %10 = arith.mulf %0, %9 : vector<72x256xf32>
    %c0_3 = arith.constant 0 : index
    %c0_4 = arith.constant 0 : index
    %11 = vector.load %arg2[%c0_3, %c0_4] : memref<1x256xf32, #tpu.memory_space<vmem>>, vector<1x256xf32>
    %cst_5 = arith.constant 1.000000e+00 : f32
    %12 = vector.broadcast %cst_5 : f32 to vector<1x256xf32>
    %13 = arith.addf %12, %11 : vector<1x256xf32>
    %14 = vector.broadcast %13 : vector<1x256xf32> to vector<72x256xf32>
    %15 = arith.mulf %14, %10 : vector<72x256xf32>
    %c0_6 = arith.constant 0 : index
    %c0_7 = arith.constant 0 : index
    %16 = vector.load %arg3[%c0_6, %c0_7] : memref<72x256xf32, #tpu.memory_space<vmem>>, vector<72x256xf32>
    tpu.vector_store %arg3[%c0_6, %c0_7], %15 {strides = array<i32>} : memref<72x256xf32, #tpu.memory_space<vmem>>, vector<72x256xf32>,
    return
  }
  func.func @transform_0(%arg0: i32) -> (i32, i32) {
    %c0_i32 = arith.constant 0 : i32
    %c0_i32_0 = arith.constant 0 : i32
    return %arg0, %c0_i32 : i32, i32
  }
  func.func @transform_1(%arg0: i32) -> (i32, i32) {
    %c0_i32 = arith.constant 0 : i32
    %c0_i32_0 = arith.constant 0 : i32
    %c0_i32_1 = arith.constant 0 : i32
    return %c0_i32, %c0_i32_0 : i32, i32
  }
  func.func @transform_2(%arg0: i32) -> (i32, i32) {
    %c0_i32 = arith.constant 0 : i32
    %c0_i32_0 = arith.constant 0 : i32
    return %arg0, %c0_i32 : i32, i32
  }
}

</mosaic_0001>

<bundles_post_ra>
// kernel: tpu_custom_call.1
= control target key start
LH: loop header
LB: loop body
LE: loop exit
PB: predicated region body
PF: predicated region fallthrough
CT: control target
= control target key end

     0   :  { %7 = vsyncpa [#allocation3], 0  ;;  %s932_s0 = inlined_call_operand.hbm [shape: f32[140,256], index: 0, kind: input, shape index: {}]   ;;  %s933_s1 = inlined_call_operand.vmem [shape: f32[1,256], index: 1, kind: input, shape index: {}]   ;;  %s934_s2 = inlined_call_operand.hbm [shape: f32[140,256], index: 2, kind: output, shape index: {}]  }
   0x1   :  { %9 = vsyncpa [#allocation3 + $0x1], 0 }
   0x2   :  { %10 = vsyncpa [#allocation4], 0 }
   0x3   :  { %12 = vsyncpa [#allocation4 + $0x1], 0  ;;  %s616_s9 = smov 0   ;;  %s618_s10 = smov 0  }
   0x4   :  { %s620_s11 = smov 0   ;;  %s622_s12 = smov 0  }
   0x5 LB: > { %s637_s13 = sadd.s32 4294967295, %s593_s12   ;;  %s411_s14 = sadd.s32 4294967294, %s593_s12   ;;  %s593_s12 = sphi %s622_s12, %s946_s12   ;;  %s589_s11 = sphi %s620_s11, %s945_s11   ;;  %s585_s10 = sphi %s618_s10, %s944_s10   ;;  %s581_s9 = sphi %s616_s9, %s943_s9  }
   0x6   : > { %s641_s15 = sadd.s32 1, %s593_s12   ;;  %s25_s16 = sadd.s32 1, %s589_s11 }
   0x7   : > { %s22_s17 = ssub.s32 %s593_s12, %s641_s15  ;;  %p32_p0 = scmp.ne.s32.totalorder %s589_s11, %s585_s10 }
   0x8   : > { %p23_p1 = scmp.eq.s32.totalorder %s22_s17, 0  ;;  %p33_p2 = scmp.eq.s32.totalorder %s593_s12, 0 }
   0x9   : > { %p38_p3 = scmp.ne.s32.totalorder %s585_s10, %s581_s9  ;;  %p39_p4 = scmp.eq.s32.totalorder %s637_s13, 0 }
   0xa   : > { %s653_s18 = scalar_select %p23_p1, %s589_s11, %s25_s16  }
   0xb   : > { %p34_p5 = por %p33_p2, %p32_p0  ;;  %p655_p6 = por %p39_p4, %p38_p3 }
   0xc   : > { %p83_p7 = scmp.eq.s32.totalorder %s637_s13, 1  ;;  %p89_p8 = scmp.eq.s32.totalorder %s411_s14, 1 }
   0xd   : > { %p441_p10 = scmp.lt.s32.totalorder %s593_s12, 2  ;;  %s112_s22 = sand.u32 1, %s589_s11  }
   0xe   : > { %p662_p11 = por %p83_p7, %p32_p0  ;;  %p666_p12 = por %p89_p8, %p38_p3 }
   0xf   : > { %s425_s23 = smul.u32 2304, %s593_s12  ;;  %p677_p13 = pnand %p441_p10, %p34_p5 }
  0x10   : > { %s937_s20 = scalar_select %p662_p11, 1, 0 }
  0x11   : > { %s938_s21 = scalar_select %p666_p12, 1, 0 }
  0x12   : > { %s427_s24 = smul.u32 144, %s112_s22  ;;  %s675_s27 = scalar_lea.hbm %s932_s0, %s425_s23 }
  0x13   : > { %s683_s3 = scalar_lea.sflag [#allocation3], %s112_s22  ;;  %s497_s4 = scalar_lea.hbm %s675_s27, 2304 }
  0x14   : > { %s116_s29 = scalar_lea.vmem [#allocation2], %s427_s24  ;;  %p498_p0 = scmp.ne.s32.totalorder %s675_s27, %s497_s4 }
  0x15   : > { %s124_s30 = sshll.u32 %s116_s29, 4  ;;  %p499_p1 = pneg %p677_p13  ;;  %s681_s30 = int_to_ptr.vmem [resolvable:$true] %s124_s30 }
  0x16   : > { %s502_s7 = scalar_lea.hbm %s932_s0, 4608  ;;  %p503_p4 = scmp.lt.u32.totalorder %s675_s27, %s932_s0 }
  0x17   : > { %p500_p2 = pnand %p499_p1, %p498_p0  ;;  %p504_p5 = scmp.lt.u32.totalorder %s502_s7, %s497_s4 }
  0x18   : > { %p506_p8 = scmp.lt.u32.totalorder %s497_s4, %s675_s27 }
  0x19   : > { %p501_p3 = pneg %p500_p2  ;;  %p505_p7 = por %p504_p5, %p503_p4 }
  0x1b   : > { %p507_p10 = por %p506_p8, %p505_p7 }
  0x1d   : > { %p508_p9 = pnand %p507_p10, %p501_p3 }
  0x1f   : > { %511 = shalt.err (!%p508_p9)
}
  0x20   : > { %s512_s16 = scalar_lea.vmem %s681_s30, 2304  ;;  %s595_s17 = smov [#allocation2]  }
  0x21   : > { %p513_p0 = scmp.ne.s32.totalorder %s681_s30, %s512_s16  ;;  %s517_s22 = sshll.u32 %s595_s17, 4  ;;  %s518_s22 = int_to_ptr.vmem [resolvable:$false] %s517_s22 }
  0x22   : > { %s519_s23 = scalar_lea.vmem %s518_s22, 4608  ;;  %p520_p11 = scmp.lt.s32.totalorder %s681_s30, %s518_s22 }
  0x23   : > { %p515_p2 = pnand %p513_p0, %p499_p1  ;;  %p521_p4 = scmp.lt.s32.totalorder %s519_s23, %s512_s16 }
  0x25   : > { %p516_p12 = pneg %p515_p2  ;;  %p522_p5 = por %p521_p4, %p520_p11 }
  0x27   : > { %p523_p7 = pnand %p522_p5, %p516_p12 }
  0x29   : > { %526 = shalt.err (!%p523_p7)
}
  0x2a   : > { %s596_s24 = smov 256   ;;  %s597_s25 = smov 16  }
  0x2b   : > { %436 = dma.hbm_to_vmem [thread:$0]  (!%p677_p13), %s675_s27, 2304, %s681_s30, %s683_s3, %s596_s24, %s596_s24, %s597_s25  }
  0x2c   : > { %p416_p9 = scmp.ge.s32.totalorder %s593_s12, 1  ;;  %p132_p1 = scmp.lt.s32.totalorder %s593_s12, 3 }
  0x2e   : > { %p133_p3 = pnand %p416_p9, %p132_p1 }
  0x2f   : > { %s714_s26 = sand.u32 (!%p133_p3), 1, %s585_s10  }
  0x30   : > { %136 = sbr.rel (%p133_p3) target bundleno = 253 (0xfd), region = 28  ;;  %s139_s4 = scalar_lea.sflag (!%p133_p3), [#allocation3], %s714_s26 }
  0x31   : > { %s428_s29 = smul.u32 (!%p133_p3), 144, %s714_s26 }
  0x33   : > { %s720_s5 = scalar_lea.vmem (!%p133_p3), [#allocation2], %s428_s29 }
  0x37   : > { %572 = dma.done.wait (%p655_p6), %s139_s4, 2304  }
  0x38   : > { %574 = vsyncadd (%p655_p6), %s139_s4, 4294964992  ;;  %v727_v0 = vld [vmem:[%s720_s5] sm:$0xff]  ;;  %v730_v1 = vld [vmem:[%s720_s5 + $0x8] sm:$0xff]  ;;  %v277_v46 = vlaneseq  ;;  %s833_s28 = scalar_lea.vmem [#allocation5], %s428_s29  ;;  %s426_s30 = smul.u32 2304, %s637_s13 }
  0x39   : > { %v733_v2 = vld [vmem:[%s720_s5 + $0x20] sm:$0xff]  ;;  %v183_v3 = vmul.f32 %v727_v0, %v727_v0  ;;  %v184_v4 = vmul.f32 %v730_v1, %v730_v1  ;;  %v740_v5 = vld [vmem:[%s720_s5 + $0x28] sm:$0xff]  ;;  %v745_v7 = vld [vmem:[%s720_s5 + $0x10] sm:$0xff]  ;;  %s338_s3 = sshll.u32 %s833_s28, 4  ;;  %s324_s8 = scalar_lea.sflag [#allocation4], %s714_s26  ;;  %s884_s3 = int_to_ptr.vmem [resolvable:$true] %s338_s3 }
  0x3a   : > { %v187_v6 = vmul.f32 %v733_v2, %v733_v2  ;;  %v748_v8 = vld [vmem:[%s720_s5 + $0x18] sm:$0xff]  ;;  %v188_v9 = vmul.f32 %v740_v5, %v740_v5  ;;  %v185_v10 = vmul.f32 %v745_v7, %v745_v7  ;;  %v757_v12 = vld [vmem:[%s720_s5 + $0x30] sm:$0xff]  ;;  %v763_v14 = vld [vmem:[%s720_s5 + $0x40] sm:$0xff]  ;;  %v278_v53 = vshrl.u32 %v277_v46, 7  ;;  %s882_s7 = scalar_lea.hbm %s934_s2, %s426_s30  ;;  %s527_s14 = scalar_lea.vmem %s884_s3, 2304 }
  0x3b   : > { %v186_v11 = vmul.f32 %v748_v8, %v748_v8  ;;  %v760_v13 = vld [vmem:[%s720_s5 + $0x38] sm:$0xff]  ;;  %v201_v15 = vadd.f32 %v184_v4, %v183_v3  ;;  %v189_v16 = vmul.f32 %v757_v12, %v757_v12  ;;  %v770_v18 = vld [vmem:[%s720_s5 + $0x48] sm:$0xff]  ;;  %v773_v19 = vld [vmem:[%s720_s5 + $0x50] sm:$0xff]  ;;  %v191_v23 = vmul.f32 %v763_v14, %v763_v14  ;;  %p528_p6 = scmp.ne.s32.totalorder %s884_s3, %s527_s14  ;;  %p940_p11 = scmp.ne.s32.totalorder %s937_s20, 0 }
  0x3c   : > { %v190_v17 = vmul.f32 %v760_v13, %v760_v13  ;;  %v776_v20 = vld [vmem:[%s720_s5 + $0x58] sm:$0xff]  ;;  %v207_v21 = vadd.f32 %v188_v9, %v187_v6  ;;  %v192_v24 = vmul.f32 %v770_v18, %v770_v18  ;;  %v193_v26 = vmul.f32 %v773_v19, %v773_v19  ;;  %v787_v28 = vld [vmem:[%s720_s5 + $0x60] sm:$0xff]  ;;  %v790_v29 = vld [vmem:[%s720_s5 + $0x68] sm:$0xff]  ;;  %s598_s16 = smov [#allocation5]  }
  0x3d   : > { %202 = vadd.xlane.f32.xlu0 %v201_v15  ;;  %v204_v22 = vadd.f32 %v186_v11, %v185_v10  ;;  %v194_v27 = vmul.f32 %v776_v20, %v776_v20  ;;  %v793_v30 = vld [vmem:[%s720_s5 + $0x70] sm:$0xff]  ;;  %v796_v31 = vld [vmem:[%s720_s5 + $0x78] sm:$0xff]  ;;  %v195_v33 = vmul.f32 %v787_v28, %v787_v28  ;;  %v196_v34 = vmul.f32 %v790_v29, %v790_v29  ;;  %v807_v38 = vld [vmem:[%s720_s5 + $0x80] sm:$0xff]  ;;  %p529_p12 = pnand %p528_p6, %p940_p11  ;;  %s531_s17 = sshll.u32 %s598_s16, 4  ;;  %s532_s17 = int_to_ptr.vmem [resolvable:$false] %s531_s17 }
  0x3e   : > { %208 = vadd.xlane.f32.xlu1 %v207_v21  ;;  %v210_v25 = vadd.f32 %v190_v17, %v189_v16  ;;  %v213_v32 = vadd.f32 %v192_v24, %v191_v23  ;;  %v197_v36 = vmul.f32 %v793_v30, %v793_v30  ;;  %v198_v37 = vmul.f32 %v796_v31, %v796_v31  ;;  %v810_v39 = vld [vmem:[%s720_s5 + $0x88] sm:$0xff]  ;;  %v274_v57 = vld [vmem:[%s933_s1] sm:$0x3]  ;;  %s533_s22 = scalar_lea.vmem %s532_s17, 4608  ;;  %p534_p8 = scmp.lt.s32.totalorder %s884_s3, %s532_s17 }
  0x3f   : > { %v216_v35 = vadd.f32 %v194_v27, %v193_v26  ;;  %v219_v40 = vadd.f32 %v196_v34, %v195_v33  ;;  %v199_v41 = vmul.f32 %v807_v38, %v807_v38  ;;  %v200_v42 = vmul.f32 %v810_v39, %v810_v39  ;;  %p530_p13 = pneg %p529_p12  ;;  %p535_p10 = scmp.lt.s32.totalorder %s533_s22, %s527_s14 }
  0x40   : > { %v222_v43 = vadd.f32 %v198_v37, %v197_v36  ;;  %v279_v61 = vsub.s32 0, %v278_v53  ;;  %v275_v3 = vadd.f32 1.0, %v274_v57  ;;  %v283_v4 = vsub.s32 1, %v278_v53 }
  0x41   : > { %205 = vadd.xlane.f32.xlu0 %v204_v22  ;;  %v225_v44 = vadd.f32 %v200_v42, %v199_v41  ;;  %p536_p0 = por %p535_p10, %p534_p8 }
  0x42   : > { %211 = vadd.xlane.f32.xlu1 %v210_v25  ;;  %v819_v17 = vrot.slane %v275_v3, %v279_v61  ;;  %v821_v21 = vrot.slane %v275_v3, %v283_v4 }
  0x43   : > { %p537_p2 = pnand %p536_p0, %p530_p13 }
  0x45   : > { %214 = vadd.xlane.f32.xlu0 %v213_v32 }
  0x46   : > { %217 = vadd.xlane.f32.xlu1 %v216_v35 }
  0x49   : > { %220 = vadd.xlane.f32.xlu0 %v219_v40 }
  0x4a   : > { %223 = vadd.xlane.f32.xlu1 %v222_v43 }
  0x4d   : > { %226 = vadd.xlane.f32.xlu0 %v225_v44 }
  0xca   : > { %v203_v45 = vpop.xlane.xlu0 %202 }
  0xcb   : > { %v229_v47 = vmul.f32 0.00390625, %v203_v45  ;;  %v209_v48 = vpop.xlane.xlu1 %208 }
  0xcc   : > { %v231_v49 = vmul.f32 0.00390625, %v209_v48 }
  0xcd   : > { %v238_v50 = vadd.f32 1e-06, %v229_v47 }
  0xce   : > { %v240_v51 = vadd.f32 1e-06, %v231_v49  ;;  %v206_v52 = vpop.xlane.xlu0 %205 }
  0xcf   : > { %479 = vrsqrt.f32 %v238_v50  ;;  %v230_v54 = vmul.f32 0.00390625, %v206_v52  ;;  %v212_v55 = vpop.xlane.xlu1 %211 }
  0xd0   : > { %481 = vrsqrt.f32 %v240_v51  ;;  %v232_v56 = vmul.f32 0.00390625, %v212_v55 }
  0xd1   : > { %v239_v58 = vadd.f32 1e-06, %v230_v54 }
  0xd2   : > { %v241_v59 = vadd.f32 1e-06, %v232_v56  ;;  %v215_v60 = vpop.xlane.xlu0 %214 }
  0xd3   : > { %483 = vrsqrt.f32 %v239_v58  ;;  %v233_v62 = vmul.f32 0.00390625, %v215_v60  ;;  %v218_v63 = vpop.xlane.xlu1 %217 }
  0xd4   : > { %485 = vrsqrt.f32 %v241_v59  ;;  %v234_v6 = vmul.f32 0.00390625, %v218_v63 }
  0xd5   : > { %v242_v9 = vadd.f32 1e-06, %v233_v62 }
  0xd6   : > { %v243_v10 = vadd.f32 1e-06, %v234_v6  ;;  %v221_v11 = vpop.xlane.xlu0 %220 }
  0xd7   : > { %487 = vrsqrt.f32 %v242_v9  ;;  %v235_v15 = vmul.f32 0.00390625, %v221_v11  ;;  %v224_v16 = vpop.xlane.xlu1 %223 }
  0xd8   : > { %489 = vrsqrt.f32 %v243_v10  ;;  %v236_v22 = vmul.f32 0.00390625, %v224_v16 }
  0xd9   : > { %v480_v23 = vpop.eup %479  ;;  %v244_v24 = vadd.f32 1e-06, %v235_v15 }
  0xda   : > { %v482_v25 = vpop.eup %481  ;;  %v256_v26 = vmul.f32 %v480_v23, %v727_v0  ;;  %v257_v27 = vmul.f32 %v480_v23, %v730_v1  ;;  %v245_v32 = vadd.f32 1e-06, %v236_v22  ;;  %v227_v33 = vpop.xlane.xlu0 %226 }
  0xdb   : > { %v260_v34 = vmul.f32 %v482_v25, %v733_v2  ;;  %v261_v35 = vmul.f32 %v482_v25, %v740_v5  ;;  %491 = vrsqrt.f32 %v244_v24  ;;  %v237_v36 = vmul.f32 0.00390625, %v227_v33 }
  0xdc   : > { %v287_v37 = vmul.f32 %v819_v17, %v256_v26  ;;  %v288_v40 = vmul.f32 %v821_v21, %v257_v27  ;;  %493 = vrsqrt.f32 %v245_v32 }
  0xdd   : > { %v484_v41 = vpop.eup %483  ;;  %v291_v42 = vmul.f32 %v819_v17, %v260_v34  ;;  %v292_v0 = vmul.f32 %v821_v21, %v261_v35  ;;  %v246_v43 = vadd.f32 1e-06, %v237_v36 }
  0xde   : > { %v486_v1 = vpop.eup %485  ;;  %305 = vst [vmem:[%s833_s28] sm:$0xff] %v287_v37  ;;  %306 = vst [vmem:[%s833_s28 + $0x8] sm:$0xff] %v288_v40  ;;  %v258_v2 = vmul.f32 %v484_v41, %v745_v7  ;;  %v259_v5 = vmul.f32 %v484_v41, %v748_v8 }
  0xdf   : > { %309 = vst [vmem:[%s833_s28 + $0x20] sm:$0xff] %v291_v42  ;;  %310 = vst [vmem:[%s833_s28 + $0x28] sm:$0xff] %v292_v0  ;;  %v262_v44 = vmul.f32 %v486_v1, %v757_v12  ;;  %v263_v45 = vmul.f32 %v486_v1, %v760_v13  ;;  %495 = vrsqrt.f32 %v246_v43 }
  0xe0   : > { %v289_v46 = vmul.f32 %v819_v17, %v258_v2  ;;  %v290_v47 = vmul.f32 %v821_v21, %v259_v5 }
  0xe1   : > { %v488_v48 = vpop.eup %487  ;;  %v293_v49 = vmul.f32 %v819_v17, %v262_v44  ;;  %v294_v7 = vmul.f32 %v821_v21, %v263_v45 }
  0xe2   : > { %v490_v8 = vpop.eup %489  ;;  %307 = vst [vmem:[%s833_s28 + $0x10] sm:$0xff] %v289_v46  ;;  %308 = vst [vmem:[%s833_s28 + $0x18] sm:$0xff] %v290_v47  ;;  %v264_v50 = vmul.f32 %v488_v48, %v763_v14  ;;  %v265_v12 = vmul.f32 %v488_v48, %v770_v18 }
  0xe3   : > { %311 = vst [vmem:[%s833_s28 + $0x30] sm:$0xff] %v293_v49  ;;  %312 = vst [vmem:[%s833_s28 + $0x38] sm:$0xff] %v294_v7  ;;  %v266_v13 = vmul.f32 %v490_v8, %v773_v19  ;;  %v267_v51 = vmul.f32 %v490_v8, %v776_v20 }
  0xe4   : > { %v295_v52 = vmul.f32 %v819_v17, %v264_v50  ;;  %v296_v53 = vmul.f32 %v821_v21, %v265_v12 }
  0xe5   : > { %v492_v54 = vpop.eup %491  ;;  %v297_v55 = vmul.f32 %v819_v17, %v266_v13  ;;  %v298_v14 = vmul.f32 %v821_v21, %v267_v51 }
  0xe6   : > { %v494_v56 = vpop.eup %493  ;;  %313 = vst [vmem:[%s833_s28 + $0x40] sm:$0xff] %v295_v52  ;;  %314 = vst [vmem:[%s833_s28 + $0x48] sm:$0xff] %v296_v53  ;;  %v268_v18 = vmul.f32 %v492_v54, %v787_v28  ;;  %v269_v19 = vmul.f32 %v492_v54, %v790_v29 }
  0xe7   : > { %315 = vst [vmem:[%s833_s28 + $0x50] sm:$0xff] %v297_v55  ;;  %316 = vst [vmem:[%s833_s28 + $0x58] sm:$0xff] %v298_v14  ;;  %v270_v20 = vmul.f32 %v494_v56, %v793_v30  ;;  %v271_v57 = vmul.f32 %v494_v56, %v796_v31 }
  0xe8   : > { %v299_v58 = vmul.f32 %v819_v17, %v268_v18  ;;  %v300_v59 = vmul.f32 %v821_v21, %v269_v19 }
  0xe9   : > { %v496_v28 = vpop.eup %495  ;;  %v301_v29 = vmul.f32 %v819_v17, %v270_v20  ;;  %v302_v60 = vmul.f32 %v821_v21, %v271_v57 }
  0xea   : > { %317 = vst [vmem:[%s833_s28 + $0x60] sm:$0xff] %v299_v58  ;;  %318 = vst [vmem:[%s833_s28 + $0x68] sm:$0xff] %v300_v59  ;;  %v272_v30 = vmul.f32 %v496_v28, %v807_v38  ;;  %v273_v31 = vmul.f32 %v496_v28, %v810_v39 }
  0xeb   : > { %319 = vst [vmem:[%s833_s28 + $0x70] sm:$0xff] %v301_v29  ;;  %320 = vst [vmem:[%s833_s28 + $0x78] sm:$0xff] %v302_v60 }
  0xec   : > { %v303_v61 = vmul.f32 %v819_v17, %v272_v30  ;;  %v304_v62 = vmul.f32 %v821_v21, %v273_v31 }
  0xee   : > { %321 = vst [vmem:[%s833_s28 + $0x80] sm:$0xff] %v303_v61  ;;  %322 = vst [vmem:[%s833_s28 + $0x88] sm:$0xff] %v304_v62 }
  0xef   : > { %540 = shalt.err (!%p537_p2)
}
  0xf0   : > { %s541_s23 = scalar_lea.hbm %s882_s7, 2304  ;;  %s545_s29 = scalar_lea.hbm %s934_s2, 4608 }
  0xf1   : > { %p542_p4 = scmp.ne.s32.totalorder %s882_s7, %s541_s23  ;;  %p546_p9 = scmp.lt.u32.totalorder %s882_s7, %s934_s2 }
  0xf2   : > { %p547_p1 = scmp.lt.u32.totalorder %s545_s29, %s541_s23  ;;  %p549_p6 = scmp.lt.u32.totalorder %s541_s23, %s882_s7 }
  0xf3   : > { %p543_p5 = pnand %p542_p4, %p940_p11 }
  0xf4   : > { %p548_p3 = por %p547_p1, %p546_p9 }
  0xf5   : > { %p544_p7 = pneg %p543_p5 }
  0xf6   : > { %p550_p12 = por %p549_p6, %p548_p3 }
  0xf8   : > { %p551_p13 = pnand %p550_p12, %p544_p7 }
  0xfa   : > { %554 = shalt.err (!%p551_p13)
}
  0xfb   : > { %s599_s19 = smov 256   ;;  %s600_s27 = smov 16  }
  0xfc   : > { %431 = dma.vmem_to_hbm [thread:$0]  (%p940_p11), %s884_s3, 2304, %s882_s7, %s324_s8, %s599_s19, %s599_s19, %s600_s27  }
  0xfd PF: > { %s353_s28 = sand.u32 1, %s581_s9   ;;  %p941_p8 = scmp.ne.s32.totalorder %s938_s21, 0 }
  0xfe   : > { %p942_p10 = scmp.ge.s32.totalorder %s593_s12, 2  ;;  %s354_s30 = scalar_lea.sflag [#allocation4], %s353_s28 }
 0x100   : > { %p438_p0 = pnand %p942_p10, %p941_p8 }
 0x102   : > { %576 = dma.done.wait (!%p438_p0), %s354_s30, 2304  }
 0x103   : > { %578 = vsyncadd (!%p438_p0), %s354_s30, 4294964992  ;;  %p15_p2 = scmp.ge.s32.totalorder %s641_s15, 4   ;;  %s943_s9 = smov %s585_s10 }
 0x104   : > { %s944_s10 = smov %s589_s11  ;;  %s945_s11 = smov %s653_s18 }
 0x105   : > { %s946_s12 = smov %s641_s15  ;;  %17 = sbr.rel (!%p15_p2) target bundleno = 5 (0x5), region = 73 }
 0x10c   :  { %359 = vsyncpa [#allocation3], 1 }
 0x10d   :  { %361 = vsyncpa [#allocation3 + $0x1], 1 }
 0x10e   :  { %362 = vsyncpa [#allocation4], 1 }
 0x10f   :  { %364 = vsyncpa [#allocation4 + $0x1], 1 }

</bundles_post_ra>
